<compile_context>
chip_gen: v5e
topology: v5e:2x2
jax: 0.10.0
libtpu: 0.0.40
codegen_flags: <defaults>
</compile_context>

<pallas_src>
import functools

import jax
import jax.numpy as jnp
from jax.experimental import pallas as pl
from jax.experimental.pallas import tpu as pltpu


# ----------------------------------------------------------------------------
# Kernel
# ----------------------------------------------------------------------------
def _adapter_kernel(x_ref, wd_ref, bd_ref, wu_ref, bu_ref, o_ref, *, matmul_dtype):
    """o = relu(x @ WdT + bd) @ WuT[:, cols] + bu[cols]   (weights pre-masked)."""
    x = x_ref[...].astype(matmul_dtype)                        # in-kernel cast (VPU)
    z = jnp.dot(x, wd_ref[...], preferred_element_type=jnp.float32)
    z = jnp.maximum(z + bd_ref[...], 0.0)                      # bias + relu in f32
    # NOTE: z is re-quantized to the matmul dtype between the two matmuls; this
    # extra rounding is not present in the f32 PyTorch reference (documented).
    up = jnp.dot(z.astype(wu_ref.dtype), wu_ref[...],
                 preferred_element_type=jnp.float32)
    o_ref[...] = (up + bu_ref[...]).astype(o_ref.dtype)


def _row_alignment(*dtypes):
    # Rows per packed sublane group: 8 (4-byte), 16 (2-byte), 32 (1-byte).
    return max(32 // jnp.dtype(d).itemsize for d in dtypes)


# ----------------------------------------------------------------------------
# Wrapper
# ----------------------------------------------------------------------------
@functools.partial(
    jax.jit,
    static_argnames=("tm", "matmul_dtype", "out_dtype", "weight_vmem_budget"))
def adapter_forward(x, wd, bd, wu, bu, down_mask=None, up_mask=None, *,
                    tm=512, matmul_dtype=jnp.bfloat16, out_dtype=None,
                    weight_vmem_budget=24 * 1024 * 1024):
    """
    x:  [..., input_dim]
    wd: [down_size, input_dim]   (torch nn.Linear weight layout)
    bd: [down_size]
    wu: [input_dim, down_size]
    bu: [input_dim]
    down_mask / up_mask: same shapes as wd / wu (optional; fused here, in f32).
    """
    orig_shape = x.shape
    D = orig_shape[-1]
    xf = x.reshape(-1, D)
    N = xf.shape[0]
    d_down = wd.shape[0]

    out_dtype = jnp.dtype(x.dtype) if out_dtype is None else jnp.dtype(out_dtype)
    mm_dtype = jnp.dtype(matmul_dtype)

    # forward_with_mask semantics: one-time mask fusion, in f32, outside the grid.
    if down_mask is not None:
        wd = wd * down_mask
    if up_mask is not None:
        wu = wu * up_mask

    # Pre-transpose so the kernel does row-major x @ W_T; cast weights for MXU.
    wd_t = wd.T.astype(mm_dtype)                   # (D, d_down)
    wu_t = wu.T.astype(mm_dtype)                   # (d_down, D)
    bd2 = bd.reshape(1, d_down).astype(jnp.float32)
    bu2 = bu.reshape(1, D).astype(jnp.float32)

    x_isz = jnp.dtype(x.dtype).itemsize
    o_isz = out_dtype.itemsize
    m_isz = mm_dtype.itemsize

    # ---- Row tiling ---------------------------------------------------------
    row_align = _row_alignment(x.dtype, out_dtype)
    if N <= tm:
        tm_eff = N                                  # full-extent block: always legal
        # Split one big block in two (aligned) so both v7x TensorCores get work.
        half = (((N + 1) // 2 + row_align - 1) // row_align) * row_align
        if half < N:
            tm_eff = half
    else:
        tm_eff = max(row_align, (tm // row_align) * row_align)
    ni = pl.cdiv(N, tm_eff)

    # ---- Column tiling (v7x VMEM safety: 64 MiB per TensorCore) --------------
    tn = D
    nj = 1
    if 2 * D * d_down * m_isz > weight_vmem_budget and D % 128 == 0:
        # Stream the up-projection over output columns; Wd stays resident.
        tn = 128
        for cand in range(D, 0, -128):
            if D % cand == 0 and (D + 2 * cand) * d_down * m_isz <= weight_vmem_budget:
                tn = cand
                break
        nj = D // tn

    # ---- BlockSpecs ----------------------------------------------------------
    resident = pl.Buffered(1)          # constant-index blocks: single-buffered
    x_spec = pl.BlockSpec((tm_eff, D), lambda i, j: (i, 0))
    wd_spec = pl.BlockSpec((D, d_down), lambda i, j: (0, 0), pipeline_mode=resident)
    bd_spec = pl.BlockSpec((1, d_down), lambda i, j: (0, 0), pipeline_mode=resident)
    if nj == 1:
        wu_spec = pl.BlockSpec((d_down, D), lambda i, j: (0, 0), pipeline_mode=resident)
        bu_spec = pl.BlockSpec((1, D), lambda i, j: (0, 0), pipeline_mode=resident)
    else:
        wu_spec = pl.BlockSpec((d_down, tn), lambda i, j: (0, j))
        bu_spec = pl.BlockSpec((1, tn), lambda i, j: (0, j))
    out_spec = pl.BlockSpec((tm_eff, tn), lambda i, j: (i, j))

    # ---- VMEM budget (actual footprint + headroom) ----------------------------
    wu_bufs = 1 if nj == 1 else 2
    vmem_bytes = (
        2 * tm_eff * D * x_isz                       # x block (double-buffered)
        + 2 * tm_eff * tn * o_isz                    # out block (double-buffered)
        + D * d_down * m_isz                         # Wd (resident, 1 buffer)
        + wu_bufs * d_down * tn * m_isz              # Wu block(s)
        + 8 * (d_down + wu_bufs * tn) * 4            # biases (sublane-padded)
        + tm_eff * d_down * (4 + m_isz)              # z in f32 + matmul-dtype copy
        + tm_eff * D * m_isz                         # in-kernel cast copy of x
    )
    vmem_limit = int(min(128 * 1024 * 1024,
                         max(vmem_bytes * 3 // 2 + (2 << 20), 16 << 20)))

    # ---- Cost estimate (advisory, for XLA scheduling) -------------------------
    flops = 2 * N * D * d_down * (nj + 1)            # down-proj redone per col block
    bytes_accessed = int(N * D * x_isz + N * D * o_isz
                         + 2 * D * d_down * m_isz + (D + d_down) * 4)
    cost = pl.CostEstimate(flops=flops, transcendentals=0,
                           bytes_accessed=bytes_accessed)

    out = pl.pallas_call(
        functools.partial(_adapter_kernel, matmul_dtype=mm_dtype),
        out_shape=jax.ShapeDtypeStruct((N, D), out_dtype),
        grid_spec=pltpu.PrefetchScalarGridSpec(
            num_scalar_prefetch=0,
            grid=(ni, nj),
            in_specs=[x_spec, wd_spec, bd_spec, wu_spec, bu_spec],
            out_specs=out_spec,
        ),
        compiler_params=pltpu.CompilerParams(
            dimension_semantics=("parallel", "parallel"),
            vmem_limit_bytes=vmem_limit),
        cost_estimate=cost,
    )(xf, wd_t, bd2, wu_t, bu2)

    return out.reshape(orig_shape)


# ----------------------------------------------------------------------------
# Main
# ----------------------------------------------------------------------------
if __name__ == "__main__":
    # Config (synthetic): input_dim=32, reduction_factor=2 -> down_size=16,
    # weight_init_range (std) = 1e-2, non_linearity = "relu".
    input_dim = 32
    reduction_factor = 2
    down_size = input_dim // reduction_factor
    std = 1e-2

    batch, seq = 2, 8

    key = jax.random.PRNGKey(0)
    kx, kwd, kbd, kwu, kbu, kdm, kum = jax.random.split(key, 7)

    x = jax.random.normal(kx, (batch, seq, input_dim), dtype=jnp.float32)

    wd = std * jax.random.normal(kwd, (down_size, input_dim), dtype=jnp.float32)
    bd = std * jax.random.normal(kbd, (down_size,), dtype=jnp.float32)
    wu = std * jax.random.normal(kwu, (input_dim, down_size), dtype=jnp.float32)
    bu = std * jax.random.normal(kbu, (input_dim,), dtype=jnp.float32)

    down_mask = (jax.random.uniform(kdm, (down_size, input_dim)) > 0.5
                 ).astype(jnp.float32)
    up_mask = (jax.random.uniform(kum, (input_dim, down_size)) > 0.5
               ).astype(jnp.float32)

    # Pure-JAX reference (matches the PyTorch module).
    def ref(x, wd, bd, wu, bu, dm=None, um=None):
        w1 = wd if dm is None else wd * dm
        w2 = wu if um is None else wu * um
        z = jnp.maximum(x @ w1.T + bd, 0.0)
        return z @ w2.T + bu

    # Path 1: no masks — f32 MXU path (tight check; MXU f32 is multi-pass bf16,
    # not bit-exact, but far inside tolerance at these magnitudes).
    out_f32 = jax.block_until_ready(
        adapter_forward(x, wd, bd, wu, bu, matmul_dtype=jnp.float32))
    assert jnp.allclose(out_f32, ref(x, wd, bd, wu, bu),
                        atol=1e-5, rtol=1e-5), "no-mask f32 mismatch"

    # Path 1: no masks — default bf16 MXU path (perf config, looser tolerance).
    out_bf = jax.block_until_ready(adapter_forward(x, wd, bd, wu, bu))
    assert jnp.allclose(out_bf, ref(x, wd, bd, wu, bu),
                        atol=2e-3, rtol=2e-2), "no-mask bf16 mismatch"

    # Path 2: forward_with_mask — f32 (tight check).
    out_m = jax.block_until_ready(
        adapter_forward(x, wd, bd, wu, bu, down_mask, up_mask,
                        matmul_dtype=jnp.float32))
    assert jnp.allclose(out_m, ref(x, wd, bd, wu, bu, down_mask, up_mask),
                        atol=1e-5, rtol=1e-5), "mask f32 mismatch"

    # Path 2: forward_with_mask — default bf16.
    out_mb = jax.block_until_ready(
        adapter_forward(x, wd, bd, wu, bu, down_mask, up_mask))
    assert jnp.allclose(out_mb, ref(x, wd, bd, wu, bu, down_mask, up_mask),
                        atol=2e-3, rtol=2e-2), "mask bf16 mismatch"

    # Optional bf16-output path (halves store traffic for bf16 consumers).
    out_bo = jax.block_until_ready(
        adapter_forward(x, wd, bd, wu, bu, out_dtype=jnp.bfloat16))
    assert jnp.allclose(out_bo.astype(jnp.float32), ref(x, wd, bd, wu, bu),
                        atol=2e-3, rtol=2e-2), "bf16-output mismatch"

    print("KERNEL_OK")
</pallas_src>

<mosaic_0001>
module attributes {stable_mosaic.version = 11 : i64} {
  func.func @_adapter_kernel(%arg0: i32, %arg1: i32, %arg2: memref<8x32xf32, #tpu.memory_space<vmem>>, %arg3: memref<32x16xf32, #tpu.memory_space<vmem>>, %arg4: memref<1x16xf32, #tpu.memory_space<vmem>>, %arg5: memref<16x32xf32, #tpu.memory_space<vmem>>, %arg6: memref<1x32xf32, #tpu.memory_space<vmem>>, %arg7: memref<8x32xf32, #tpu.memory_space<vmem>>) attributes {dimension_semantics = [#tpu.dimension_semantics<parallel>, #tpu.dimension_semantics<parallel>], iteration_bounds = array<i64: 2, 1>, scalar_prefetch = 0 : i64, scratch_operands = 0 : i64, tpu.core_type = #tpu.core_type<tc>, window_params = [{transform_indices = @transform_0, window_bounds = array<i64: 8, 32>}, {pipeline_mode = #tpu.pipeline_mode<synchronous>, transform_indices = @transform_1, window_bounds = array<i64: 32, 16>}, {pipeline_mode = #tpu.pipeline_mode<synchronous>, transform_indices = @transform_2, window_bounds = array<i64: 1, 16>}, {pipeline_mode = #tpu.pipeline_mode<synchronous>, transform_indices = @transform_3, window_bounds = array<i64: 16, 32>}, {pipeline_mode = #tpu.pipeline_mode<synchronous>, transform_indices = @transform_4, window_bounds = array<i64: 1, 32>}, {transform_indices = @transform_5, window_bounds = array<i64: 8, 32>}]} {
    %c0 = arith.constant 0 : index
    %c0_0 = arith.constant 0 : index
    %0 = vector.load %arg2[%c0, %c0_0] : memref<8x32xf32, #tpu.memory_space<vmem>>, vector<8x32xf32>
    %c0_1 = arith.constant 0 : index
    %c0_2 = arith.constant 0 : index
    %1 = vector.load %arg3[%c0_1, %c0_2] : memref<32x16xf32, #tpu.memory_space<vmem>>, vector<32x16xf32>
    %cst = arith.constant dense<0.000000e+00> : vector<8x16xf32>
    %2 = tpu.matmul %0, %1, %cst {dimension_numbers = #tpu.dot_dimension_numbers<[1], [0], [0], [1], [0, 0, 1, 1], [], []>} : vector<8x32xf32>, vector<32x16xf32>, vector<8x16xf32> -> vector<8x16xf32>
    %c0_3 = arith.constant 0 : index
    %c0_4 = arith.constant 0 : index
    %3 = vector.load %arg4[%c0_3, %c0_4] : memref<1x16xf32, #tpu.memory_space<vmem>>, vector<1x16xf32>
    %4 = vector.broadcast %3 : vector<1x16xf32> to vector<8x16xf32>
    %5 = arith.addf %2, %4 : vector<8x16xf32>
    %cst_5 = arith.constant 0.000000e+00 : f32
    %6 = vector.broadcast %cst_5 : f32 to vector<8x16xf32>
    %7 = arith.maximumf %5, %6 : vector<8x16xf32>
    %c0_6 = arith.constant 0 : index
    %c0_7 = arith.constant 0 : index
    %8 = vector.load %arg5[%c0_6, %c0_7] : memref<16x32xf32, #tpu.memory_space<vmem>>, vector<16x32xf32>
    %cst_8 = arith.constant dense<0.000000e+00> : vector<8x32xf32>
    %9 = tpu.matmul %7, %8, %cst_8 {dimension_numbers = #tpu.dot_dimension_numbers<[1], [0], [0], [1], [0, 0, 1, 1], [], []>} : vector<8x16xf32>, vector<16x32xf32>, vector<8x32xf32> -> vector<8x32xf32>
    %c0_9 = arith.constant 0 : index
    %c0_10 = arith.constant 0 : index
    %10 = vector.load %arg6[%c0_9, %c0_10] : memref<1x32xf32, #tpu.memory_space<vmem>>, vector<1x32xf32>
    %11 = vector.broadcast %10 : vector<1x32xf32> to vector<8x32xf32>
    %12 = arith.addf %9, %11 : vector<8x32xf32>
    %c0_11 = arith.constant 0 : index
    %c0_12 = arith.constant 0 : index
    %13 = vector.load %arg7[%c0_11, %c0_12] : memref<8x32xf32, #tpu.memory_space<vmem>>, vector<8x32xf32>
    tpu.vector_store %arg7[%c0_11, %c0_12], %12 {strides = array<i32>} : memref<8x32xf32, #tpu.memory_space<vmem>>, vector<8x32xf32>,
    return
  }
  func.func @transform_0(%arg0: i32, %arg1: i32) -> (i32, i32) {
    %c0_i32 = arith.constant 0 : i32
    %c0_i32_0 = arith.constant 0 : i32
    return %arg0, %c0_i32 : i32, i32
  }
  func.func @transform_1(%arg0: i32, %arg1: i32) -> (i32, i32) {
    %c0_i32 = arith.constant 0 : i32
    %c0_i32_0 = arith.constant 0 : i32
    %c0_i32_1 = arith.constant 0 : i32
    return %c0_i32, %c0_i32_0 : i32, i32
  }
  func.func @transform_2(%arg0: i32, %arg1: i32) -> (i32, i32) {
    %c0_i32 = arith.constant 0 : i32
    %c0_i32_0 = arith.constant 0 : i32
    %c0_i32_1 = arith.constant 0 : i32
    return %c0_i32, %c0_i32_0 : i32, i32
  }
  func.func @transform_3(%arg0: i32, %arg1: i32) -> (i32, i32) {
    %c0_i32 = arith.constant 0 : i32
    %c0_i32_0 = arith.constant 0 : i32
    %c0_i32_1 = arith.constant 0 : i32
    return %c0_i32, %c0_i32_0 : i32, i32
  }
  func.func @transform_4(%arg0: i32, %arg1: i32) -> (i32, i32) {
    %c0_i32 = arith.constant 0 : i32
    %c0_i32_0 = arith.constant 0 : i32
    %c0_i32_1 = arith.constant 0 : i32
    return %c0_i32, %c0_i32_0 : i32, i32
  }
  func.func @transform_5(%arg0: i32, %arg1: i32) -> (i32, i32) {
    %c0_i32 = arith.constant 0 : i32
    return %arg0, %arg1 : i32, i32
  }
}

</mosaic_0001>

<bundles_post_ra>
// kernel: adapter_forward.1
= control target key start
LH: loop header
LB: loop body
LE: loop exit
PB: predicated region body
PF: predicated region fallthrough
CT: control target
= control target key end

     0   :  { %10 = vsyncpa [#allocation3], 0  ;;  %s687_s0 = inlined_call_operand.vmem [shape: f32[16,32], index: 0, kind: input, shape index: {}]   ;;  %s688_s1 = inlined_call_operand.vmem [shape: f32[32,16], index: 1, kind: input, shape index: {}]   ;;  %s689_s2 = inlined_call_operand.vmem [shape: f32[1,16], index: 2, kind: input, shape index: {}]   ;;  %s690_s3 = inlined_call_operand.vmem [shape: f32[16,32], index: 3, kind: input, shape index: {}]   ;;  %s691_s4 = inlined_call_operand.vmem [shape: f32[1,32], index: 4, kind: input, shape index: {}]   ;;  %s692_s5 = inlined_call_operand.hbm [shape: f32[16,32], index: 5, kind: output, shape index: {}]  }
   0x1   :  { %12 = vsyncpa [#allocation3 + $0x1], 0  ;;  %s564_s18 = smov 0   ;;  %s566_s19 = smov 0  }
   0x2   :  { %s568_s20 = smov 0   ;;  %s570_s21 = smov 0  }
   0x3   :  { %s572_s22 = smov 0   ;;  %s574_s23 = smov 0  }
   0x4 LB: > { %s384_s24 = sadd.s32 4294967295, %s532_s23   ;;  %s385_s25 = sadd.s32 4294967294, %s532_s23   ;;  %s532_s23 = sphi %s574_s23, %s18_s23   ;;  %s528_s22 = sphi %s572_s22, %s699_s22   ;;  %s524_s21 = sphi %s570_s21, %s698_s21   ;;  %s520_s20 = sphi %s568_s20, %s697_s20   ;;  %s516_s19 = sphi %s566_s19, %s696_s19   ;;  %s512_s18 = sphi %s564_s18, %s695_s18  }
   0x5   : > { %s30_s26 = sadd.s32 1, %s528_s22  ;;  %s149_s27 = sadd.s32 1, %s520_s20 }
   0x6   : > { %p32_p0 = scmp.ge.s32.totalorder %s30_s26, 2  ;;  %p159_p1 = scmp.ne.s32.totalorder %s520_s20, %s516_s19 }
   0x7   : > { %p160_p2 = scmp.eq.s32.totalorder %s384_s24, 1  ;;  %p165_p3 = scmp.ne.s32.totalorder %s516_s19, %s512_s18 }
   0x8   : > { %s701_s26 = smov (%p32_p0, %s30_s26), 0  ;;  %p166_p5 = scmp.eq.s32.totalorder %s385_s25, 1 }
   0x9   : > { %p604_p4 = por %p160_p2, %p159_p1  ;;  %s144_s29 = ssub.s32 %s528_s22, %s701_s26 }
   0xa   : > { %p388_p6 = scmp.ge.s32.totalorder %s532_s23, 1  ;;  %p147_p7 = scmp.eq.s32.totalorder %s144_s29, 0 }
   0xb   : > { %p611_p8 = por %p166_p5, %p165_p3  ;;  %p203_p9 = scmp.lt.s32.totalorder %s532_s23, 3 }
   0xc   : > { %s617_s6 = scalar_select %p147_p7, %s520_s20, %s149_s27  }
   0xd   : > { %p204_p10 = pnand %p388_p6, %p203_p9 }
   0xe   : > { %p230_p11 = scmp.lt.s32.totalorder (!%p204_p10), %s524_s21, 1  ;;  %s227_s11 = sand.u32 (!%p204_p10), 1, %s516_s19  }
   0xf   : > { %207 = sbr.rel (%p204_p10) target bundleno = 289 (0x121), region = 40  ;;  %s389_s12 = sshll.u32 (!%p204_p10), %s227_s11, 3 }
  0x10   : > { %s300_s7 = scalar_lea.sflag (!%p204_p10), [#allocation3], %s227_s11 }
  0x14   : > { %v238_v0 = vld [vmem:[%s688_s1 + $0x18] sm:$0xff]  ;;  %v237_v1 = vld [vmem:[%s688_s1 + $0x10] sm:$0xff]  ;;  %v236_v2 = vld [vmem:[%s688_s1 + $0x8] sm:$0xff]  ;;  %s231_s13 = scalar_select %p230_p11, %s524_s21, 1  ;;  %vm243_vm0 = vcmask 261120   ;;  %vm274_vm1 = vcmask 130048  }
  0x15   : > { %259 = vmatpush.msra.mxu0 %v238_v0  ;;  %v235_v3 = vld [vmem:[%s688_s1] sm:$0xff]  ;;  %v269_v5 = vld [vmem:[%s690_s3 + $0x8] sm:$0xff] }
  0x16   : > { %s390_s16 = sshll.u32 %s231_s13, 3  ;;  %292 = vmatpush.msra.mxu1 %v269_v5  ;;  %v268_v6 = vld [vmem:[%s690_s3] sm:$0xff]  ;;  %s394_s13 = sshll.u32 %s524_s21, 3 }
  0x17   : > { %260 = vmatpush.msra.mxu0 %v237_v1  ;;  %s233_s25 = scalar_lea.vmem %s687_s0, %s390_s16  ;;  %v452_v7 = vld [vmem:[%s689_s2] ss:$0 sm:$0xff]  ;;  %s311_s16 = scalar_lea.hbm %s692_s5, %s394_s13 }
  0x18   : > { %v234_v4 = vld [vmem:[%s233_s25] sm:$0xff]  ;;  %293 = vmatpush.msra.mxu1 %v268_v6  ;;  %s229_s25 = scalar_lea.vmem [#allocation2], %s389_s12  ;;  %s315_s29 = sshll.u32 %s311_s16, 4  ;;  %s316_s29 = int_to_ptr.hbm [resolvable:$true] %s315_s29 }
  0x19   : > { %261 = vmatpush.msra.mxu0 %v236_v2  ;;  %v453_v11 = vld [vmem:[%s691_s4] ss:$0 sm:$0xff]  ;;  %s313_s27 = sshll.u32 %s229_s25, 4  ;;  %s468_s21 = sshra.s32 %s316_s29, 4  ;;  %s314_s27 = int_to_ptr.vmem [resolvable:$true] %s313_s27  ;;  %s469_s21 = int_to_ptr.hbm [resolvable:$true] %s468_s21 }
  0x1a   : > { %s470_s8 = scalar_lea.hbm %s469_s21, 8  ;;  %s474_s12 = scalar_lea.hbm %s692_s5, 16 }
  0x1b   : > { %262 = vmatpush.msra.mxu0 %v235_v3  ;;  %p471_p12 = scmp.ne.s32.totalorder %s469_s21, %s470_s8  ;;  %p475_p1 = scmp.lt.s32.totalorder %s469_s21, %s692_s5 }
  0x1c   : > { %391 = vmatmul.msk.f32.vlgmr.msra.gmra.mxu0 %vm243_vm0, %v234_v4  ;;  %p476_p2 = scmp.lt.s32.totalorder %s474_s12, %s470_s8 }
  0x1d   : > { %p472_p13 = pnand %p471_p12, %p604_p4 }
  0x1e   : > { %p477_p3 = por %p476_p2, %p475_p1 }
  0x1f   : > { %p473_p0 = pneg %p472_p13 }
  0x21   : > { %p478_p5 = pnand %p477_p3, %p473_p0 }
  0x99   : > { %v264_v8 = vpop.f32.mrf.mxu0 }
  0x9a   : > { %v265_v9 = vadd.f32 %v452_v7, %v264_v8 }
  0x9c   : > { %v267_v10 = vmax.f32 %v265_v9, 0.0 }
  0x9e   : > { %392 = vmatmul.msk.f32.vlgmr.msra.gmra.mxu1 %vm274_vm1, %v267_v10 }
 0x11b   : > { %v295_v12 = vpop.f32.mrf.mxu1 }
 0x11c   : > { %v296_v13 = vadd.f32 %v453_v11, %v295_v12 }
 0x11e   : > { %298 = vst.msk [vmem:[%s229_s25] sm:$0xff] %vm243_vm0, %v296_v13 }
 0x11f   : > { %481 = shalt.err (!%p478_p5)
}
 0x120   : > { %397 = dma.vmem_to_hbm [thread:$0]  (%p604_p4), %s314_s27, 128, %s316_s29, %s300_s7  }
 0x121 PF: > { %p403_p6 = scmp.ge.s32.totalorder %s532_s23, 2  ;;  %s327_s11 = sand.u32 1, %s512_s18  }
 0x122   : > { %s328_s15 = scalar_lea.sflag [#allocation3], %s327_s11 }
 0x123   : > { %p400_p7 = pnand %p403_p6, %p611_p8 }
 0x125   : > { %p401_p9 = pneg %p400_p7 }
 0x127   : > { %507 = dma.done.wait (%p401_p9), %s328_s15, 128  }
 0x128   : > { %509 = vsyncadd (%p401_p9), %s328_s15, 4294967168  ;;  %s18_s23 = sadd.s32 1, %s532_s23   ;;  %s695_s18 = smov %s516_s19 }
 0x129   : > { %p15_p10 = scmp.ge.s32.totalorder %s18_s23, 4   ;;  %s696_s19 = smov %s520_s20 }
 0x12a   : > { %s697_s20 = smov %s617_s6  ;;  %s698_s21 = smov %s528_s22 }
 0x12b   : > { %s699_s22 = smov %s701_s26  ;;  %17 = sbr.rel (!%p15_p10) target bundleno = 4 (0x4), region = 75 }
 0x130   :  { %334 = vsyncpa [#allocation3], 1 }
 0x131   :  { %336 = vsyncpa [#allocation3 + $0x1], 1 }

</bundles_post_ra>
